<compile_context>
chip_gen: v5e
topology: v5e:2x2
jax: 0.10.0
libtpu: 0.0.40
codegen_flags: <defaults>
</compile_context>

<pallas_src>
import functools

import jax
import jax.numpy as jnp
from jax.experimental import pallas as pl
from jax.experimental.pallas import tpu as pltpu

_EPS = 1e-5
_LANE = 128
_SUBLANE = 8


def _round_up(x, m):
    return ((x + m - 1) // m) * m


def _vmem_capacity_bytes():
    try:
        return int(pltpu.get_tpu_info().vmem_capacity_bytes)
    except Exception:
        return 64 * 1024 * 1024   # conservative fallback (v7x per-TC VMEM)


# ------------------------------ fused kernel ------------------------------- #

def _mlp_kernel(x_ref, w0_ref, b0_ref, wh_ref, vec_ref, wl_ref, bl_ref,
                out_ref, h_ref, *, use_bn, valid_batch):
    """One grid step == one hidden block (Linear + ReLU [+ BatchNorm1d]).

    Step 0 additionally runs the first Linear+ReLU (resident weights); the
    final step additionally runs the last Linear and stores the output.
    The running activation `h` persists in a VMEM scratch across steps.
    """
    l = pl.program_id(0)

    # ---- first layer: Linear(in_size, dim) + ReLU (step 0 only) ------------
    @pl.when(l == 0)
    def _first():
        y0 = jnp.dot(x_ref[...].astype(jnp.bfloat16), w0_ref[...],
                     preferred_element_type=jnp.float32)
        h_ref[...] = jnp.maximum(y0 + b0_ref[...], 0.0)

    # ---- hidden block l: Linear(dim, dim) + ReLU (+ BatchNorm1d) -----------
    vec = vec_ref[0]                      # (8, dim_p) f32: rows 0/1/2 = b/gamma/beta
    y = jnp.dot(h_ref[...].astype(jnp.bfloat16), wh_ref[0],
                preferred_element_type=jnp.float32)
    y = jnp.maximum(y + vec[0:1, :], 0.0)

    if use_bn:
        bp = y.shape[0]
        # Padded batch rows must not contribute to the batch statistics.
        row_mask = (jax.lax.broadcasted_iota(jnp.int32, (bp, 1), 0)
                    < valid_batch).astype(jnp.float32)
        inv_b = jnp.float32(1.0 / valid_batch)
        ym = y * row_mask
        mean = jnp.sum(ym, axis=0, keepdims=True) * inv_b
        ex2 = jnp.sum(ym * ym, axis=0, keepdims=True) * inv_b
        var = jnp.maximum(ex2 - mean * mean, 0.0)     # one-pass, clamped
        inv = jax.lax.rsqrt(var + _EPS)
        y = (y - mean) * inv * vec[1:2, :] + vec[2:3, :]

    h_ref[...] = y

    # ---- last layer: Linear(dim, 1) (final step only) ----------------------
    @pl.when(l == pl.num_programs(0) - 1)
    def _last():
        o = jnp.dot(y.astype(jnp.bfloat16), wl_ref[...],
                    preferred_element_type=jnp.float32) + bl_ref[...]
        out_ref[...] = o.astype(out_ref.dtype)


# ------------------------------ host wrapper ------------------------------- #

def fused_mlp(x, params, batch_norm=True):
    """Whole-MLP forward in one pallas_call; returns a (B,) f32 vector."""
    B, din = x.shape
    in_p, dim_p = params["w_first"].shape
    n_hidden = params["w_hidden"].shape[0]
    dout_p = params["w_last"].shape[1]
    bp = _round_up(max(B, _SUBLANE), _SUBLANE)

    x_p = jnp.zeros((bp, in_p), jnp.float32).at[:B, :din].set(
        x.astype(jnp.float32))

    kernel = functools.partial(_mlp_kernel, use_bn=batch_norm, valid_batch=B)

    # Resident VMEM: x + first/last weights + double-buffered hidden stream +
    # activation scratch + output, with headroom; capped at 3/4 of physical.
    resident = (x_p.size * 4
                + params["w_first"].size * 2 + params["b_first"].size * 4
                + 2 * dim_p * dim_p * 2 + 2 * 8 * dim_p * 4
                + params["w_last"].size * 2 + params["b_last"].size * 4
                + bp * dim_p * 4 + bp * dout_p * 4)
    vmem_limit = min(max(8 << 20, 2 * resident + (2 << 20)),
                     _vmem_capacity_bytes() * 3 // 4)

    # TODO(synk): a batch-tiled / megacore-parallel variant needs a two-pass
    # BatchNorm (stats pass, then normalize); single-TC is fine at these sizes.
    grid_spec = pltpu.PrefetchScalarGridSpec(
        num_scalar_prefetch=0,
        grid=(n_hidden,),
        in_specs=[
            pl.BlockSpec((bp, in_p), lambda l: (0, 0)),            # x (resident)
            pl.BlockSpec((in_p, dim_p), lambda l: (0, 0)),         # W_first
            pl.BlockSpec((1, dim_p), lambda l: (0, 0)),            # b_first
            pl.BlockSpec((1, dim_p, dim_p), lambda l: (l, 0, 0)),  # W_hidden[l] streamed
            pl.BlockSpec((1, 8, dim_p), lambda l: (l, 0, 0)),      # b/gamma/beta[l]
            pl.BlockSpec((dim_p, dout_p), lambda l: (0, 0)),       # W_last
            pl.BlockSpec((1, dout_p), lambda l: (0, 0)),           # b_last
        ],
        out_specs=pl.BlockSpec((bp, dout_p), lambda l: (0, 0)),
        scratch_shapes=[pltpu.VMEM((bp, dim_p), jnp.float32)],     # activations
    )

    out = pl.pallas_call(
        kernel,
        out_shape=jax.ShapeDtypeStruct((bp, dout_p), jnp.float32),
        grid_spec=grid_spec,
        compiler_params=pltpu.CompilerParams(
            dimension_semantics=("arbitrary",),     # layer axis carries state
            vmem_limit_bytes=int(vmem_limit)),
    )(x_p, params["w_first"], params["b_first"],
      params["w_hidden"], params["vec_hidden"],
      params["w_last"], params["b_last"])

    # Final Linear has Dout=1; only column 0 of the padded output is real.
    return out[:B, 0]


# jit so pad + pallas_call + slice compile into one executable (review item 1).
fused_mlp_jit = jax.jit(fused_mlp, static_argnames=("batch_norm",))


# ------------------------------ parameters --------------------------------- #

def init_params(key, dim, n_layers, in_size, batch_norm=True):
    """PyTorch-style Linear init; weights stored bf16 and lane/sublane padded.

    All padding (weights, biases, gamma, beta) is zero, so padded feature
    columns stay exactly zero through every layer.
    """
    assert n_layers >= 3, "streamed kernel needs at least one hidden block"
    # TODO(synk): n_layers == 2 (no hidden Linear+ReLU+BN block) would need a
    # separate gridless path; not implemented here.
    in_p = _round_up(in_size, _LANE)
    dim_p = _round_up(dim, _LANE)
    dout_p = _LANE                        # Dout=1 padded to a full lane width
    n_hidden = n_layers - 2

    def linear(k, d_in, d_out, d_in_p, d_out_p):
        kw, kb = jax.random.split(k)
        scale = float(d_in) ** -0.5
        w = jax.random.uniform(kw, (d_in, d_out), jnp.float32, -scale, scale)
        b = jax.random.uniform(kb, (d_out,), jnp.float32, -scale, scale)
        w_p = jnp.zeros((d_in_p, d_out_p), jnp.float32).at[:d_in, :d_out].set(w)
        b_p = jnp.zeros((d_out_p,), jnp.float32).at[:d_out].set(b)
        return w_p.astype(jnp.bfloat16), b_p

    keys = jax.random.split(key, n_layers)
    w_first, b_first = linear(keys[0], in_size, dim, in_p, dim_p)

    wh, vecs = [], []
    for i in range(n_hidden):
        w, b = linear(keys[1 + i], dim, dim, dim_p, dim_p)
        wh.append(w)
        v = jnp.zeros((8, dim_p), jnp.float32).at[0].set(b)   # row 0: bias
        if batch_norm:
            v = v.at[1, :dim].set(1.0)    # row 1: gamma (padding stays 0)
            # row 2: beta stays zero
        vecs.append(v)

    w_last, b_last = linear(keys[-1], dim, 1, dim_p, dout_p)

    return {
        "w_first": w_first, "b_first": b_first[None, :],
        "w_hidden": jnp.stack(wh), "vec_hidden": jnp.stack(vecs),
        "w_last": w_last, "b_last": b_last[None, :],
    }


# ------------------------------ pure-JAX ref -------------------------------- #

def reference_forward(x, params, *, dim, in_size, batch_norm=True):
    """Training-mode forward of the PyTorch module in plain JAX, with the same
    precision policy as the kernel (bf16 matmul operands, f32 accumulation and
    f32 ReLU/BatchNorm epilogue) but the standard two-pass BN variance."""
    h = x.astype(jnp.float32)

    w0 = params["w_first"][:in_size, :dim]            # bf16
    b0 = params["b_first"][0, :dim]
    h = jnp.dot(h.astype(jnp.bfloat16), w0,
                preferred_element_type=jnp.float32) + b0
    h = jnp.maximum(h, 0.0)

    n_hidden = params["w_hidden"].shape[0]
    for l in range(n_hidden):
        w = params["w_hidden"][l][:dim, :dim]          # bf16
        b = params["vec_hidden"][l, 0, :dim]
        y = jnp.dot(h.astype(jnp.bfloat16), w,
                    preferred_element_type=jnp.float32) + b
        y = jnp.maximum(y, 0.0)
        if batch_norm:
            gamma = params["vec_hidden"][l, 1, :dim]
            beta = params["vec_hidden"][l, 2, :dim]
            mean = jnp.mean(y, axis=0, keepdims=True)
            var = jnp.mean((y - mean) ** 2, axis=0, keepdims=True)
            y = (y - mean) * jax.lax.rsqrt(var + _EPS) * gamma + beta
        h = y

    wl = params["w_last"][:dim, :1]                    # bf16
    bl = params["b_last"][0, :1]
    out = jnp.dot(h.astype(jnp.bfloat16), wl,
                  preferred_element_type=jnp.float32) + bl
    return out[:, 0]


# ----------------------------------- main ----------------------------------- #

if __name__ == "__main__":
    dim = 32
    n_layers = 4
    in_size = 64
    batch = 8

    key = jax.random.PRNGKey(0)
    key, kx = jax.random.split(key)
    x = jax.random.normal(kx, (batch, in_size), jnp.float32)
    params = init_params(key, dim, n_layers, in_size, batch_norm=True)

    # TODO(synk): BatchNorm running_mean/running_var buffers are not updated;
    # the kernel reproduces only the training-mode forward of the module.
    out = fused_mlp_jit(x, params, batch_norm=True)
    jax.block_until_ready(out)
    assert out.shape == (batch,), out.shape

    ref = reference_forward(x, params, dim=dim, in_size=in_size,
                            batch_norm=True)
    # Tolerance allows for bf16 activation-rounding differences between the
    # in-kernel MXU path and the XLA reference path (plus the one-pass BN var).
    assert jnp.allclose(out, ref, rtol=2e-2, atol=2e-2), (
        "mismatch vs pure-JAX reference",
        float(jnp.max(jnp.abs(out - ref))),
    )
    print("KERNEL_OK")
</pallas_src>

<mosaic_0001>
module attributes {stable_mosaic.version = 11 : i64} {
  func.func @_mlp_kernel(%arg0: i32, %arg1: memref<8x128xf32, #tpu.memory_space<vmem>>, %arg2: memref<128x128xbf16, #tpu.memory_space<vmem>>, %arg3: memref<1x128xf32, #tpu.memory_space<vmem>>, %arg4: memref<1x128x128xbf16, #tpu.memory_space<vmem>>, %arg5: memref<1x8x128xf32, #tpu.memory_space<vmem>>, %arg6: memref<128x128xbf16, #tpu.memory_space<vmem>>, %arg7: memref<1x128xf32, #tpu.memory_space<vmem>>, %arg8: memref<8x128xf32, #tpu.memory_space<vmem>>, %arg9: memref<8x128xf32, #tpu.memory_space<vmem>>) attributes {dimension_semantics = [#tpu.dimension_semantics<arbitrary>], iteration_bounds = array<i64: 2>, scalar_prefetch = 0 : i64, scratch_operands = 1 : i64, tpu.core_type = #tpu.core_type<tc>, window_params = [{pipeline_mode = #tpu.pipeline_mode<synchronous>, transform_indices = @transform_0, window_bounds = array<i64: 8, 128>}, {pipeline_mode = #tpu.pipeline_mode<synchronous>, transform_indices = @transform_1, window_bounds = array<i64: 128, 128>}, {pipeline_mode = #tpu.pipeline_mode<synchronous>, transform_indices = @transform_2, window_bounds = array<i64: 1, 128>}, {transform_indices = @transform_3, window_bounds = array<i64: 1, 128, 128>}, {transform_indices = @transform_4, window_bounds = array<i64: 1, 8, 128>}, {pipeline_mode = #tpu.pipeline_mode<synchronous>, transform_indices = @transform_5, window_bounds = array<i64: 128, 128>}, {pipeline_mode = #tpu.pipeline_mode<synchronous>, transform_indices = @transform_6, window_bounds = array<i64: 1, 128>}, {pipeline_mode = #tpu.pipeline_mode<synchronous>, transform_indices = @transform_7, window_bounds = array<i64: 8, 128>}]} {
    %c0_i32 = arith.constant 0 : i32
    %0 = arith.cmpi eq, %arg0, %c0_i32 : i32
    %1 = arith.extui %0 : i1 to i32
    %c0_i32_0 = arith.constant 0 : i32
    %2 = arith.cmpi ne, %1, %c0_i32_0 : i32
    scf.if %2 {
      %c0_18 = arith.constant 0 : index
      %c0_19 = arith.constant 0 : index
      %52 = vector.load %arg1[%c0_18, %c0_19] : memref<8x128xf32, #tpu.memory_space<vmem>>, vector<8x128xf32>
      %53 = arith.truncf %52 : vector<8x128xf32> to vector<8x128xbf16>
      %c0_20 = arith.constant 0 : index
      %c0_21 = arith.constant 0 : index
      %54 = vector.load %arg2[%c0_20, %c0_21] : memref<128x128xbf16, #tpu.memory_space<vmem>>, vector<128x128xbf16>
      %cst_22 = arith.constant dense<0.000000e+00> : vector<8x128xf32>
      %55 = tpu.matmul %53, %54, %cst_22 {dimension_numbers = #tpu.dot_dimension_numbers<[1], [0], [0], [1], [0, 0, 1, 1], [], []>} : vector<8x128xbf16>, vector<128x128xbf16>, vector<8x128xf32> -> vector<8x128xf32>
      %c0_23 = arith.constant 0 : index
      %c0_24 = arith.constant 0 : index
      %56 = vector.load %arg3[%c0_23, %c0_24] : memref<1x128xf32, #tpu.memory_space<vmem>>, vector<1x128xf32>
      %57 = vector.broadcast %56 : vector<1x128xf32> to vector<8x128xf32>
      %58 = arith.addf %55, %57 : vector<8x128xf32>
      %cst_25 = arith.constant 0.000000e+00 : f32
      %59 = vector.broadcast %cst_25 : f32 to vector<8x128xf32>
      %60 = arith.maximumf %58, %59 : vector<8x128xf32>
      %c0_26 = arith.constant 0 : index
      %c0_27 = arith.constant 0 : index
      %61 = vector.load %arg9[%c0_26, %c0_27] : memref<8x128xf32, #tpu.memory_space<vmem>>, vector<8x128xf32>
      tpu.vector_store %arg9[%c0_26, %c0_27], %60 {strides = array<i32>} : memref<8x128xf32, #tpu.memory_space<vmem>>, vector<8x128xf32>,
    } else {
    }
    %c0 = arith.constant 0 : index
    %c0_1 = arith.constant 0 : index
    %c0_2 = arith.constant 0 : index
    %3 = vector.load %arg5[%c0, %c0_1, %c0_2] : memref<1x8x128xf32, #tpu.memory_space<vmem>>, vector<1x8x128xf32>
    %4 = vector.shape_cast %3 : vector<1x8x128xf32> to vector<8x128xf32>
    %c0_3 = arith.constant 0 : index
    %c0_4 = arith.constant 0 : index
    %5 = vector.load %arg9[%c0_3, %c0_4] : memref<8x128xf32, #tpu.memory_space<vmem>>, vector<8x128xf32>
    %6 = arith.truncf %5 : vector<8x128xf32> to vector<8x128xbf16>
    %c0_5 = arith.constant 0 : index
    %c0_6 = arith.constant 0 : index
    %c0_7 = arith.constant 0 : index
    %7 = vector.load %arg4[%c0_5, %c0_6, %c0_7] : memref<1x128x128xbf16, #tpu.memory_space<vmem>>, vector<1x128x128xbf16>
    %8 = vector.shape_cast %7 : vector<1x128x128xbf16> to vector<128x128xbf16>
    %cst = arith.constant dense<0.000000e+00> : vector<8x128xf32>
    %9 = tpu.matmul %6, %8, %cst {dimension_numbers = #tpu.dot_dimension_numbers<[1], [0], [0], [1], [0, 0, 1, 1], [], []>} : vector<8x128xbf16>, vector<128x128xbf16>, vector<8x128xf32> -> vector<8x128xf32>
    %10 = vector.extract_strided_slice %4 {offsets = [0, 0], sizes = [1, 128], strides = [1, 1]} : vector<8x128xf32> to vector<1x128xf32>
    %11 = vector.broadcast %10 : vector<1x128xf32> to vector<8x128xf32>
    %12 = arith.addf %9, %11 : vector<8x128xf32>
    %cst_8 = arith.constant 0.000000e+00 : f32
    %13 = vector.broadcast %cst_8 : f32 to vector<8x128xf32>
    %14 = arith.maximumf %12, %13 : vector<8x128xf32>
    %15 = tpu.iota {dimensions = array<i32: 0>} : vector<8x1xi32>
    %c8_i32 = arith.constant 8 : i32
    %16 = vector.broadcast %c8_i32 : i32 to vector<8x1xi32>
    %17 = arith.cmpi slt, %15, %16 : vector<8x1xi32>
    %18 = arith.extui %17 : vector<8x1xi1> to vector<8x1xi32>
    %19 = arith.sitofp %18 : vector<8x1xi32> to vector<8x1xf32>
    %20 = vector.broadcast %19 : vector<8x1xf32> to vector<8x128xf32>
    %21 = arith.mulf %14, %20 : vector<8x128xf32>
    %cst_9 = arith.constant dense<0.000000e+00> : vector<128xf32>
    %22 = vector.multi_reduction <add>, %21, %cst_9 [0] : vector<8x128xf32> to vector<128xf32>
    %23 = vector.shape_cast %22 : vector<128xf32> to vector<1x128xf32>
    %cst_10 = arith.constant 1.250000e-01 : f32
    %24 = vector.broadcast %cst_10 : f32 to vector<1x128xf32>
    %25 = arith.mulf %23, %24 : vector<1x128xf32>
    %26 = arith.mulf %21, %21 : vector<8x128xf32>
    %cst_11 = arith.constant dense<0.000000e+00> : vector<128xf32>
    %27 = vector.multi_reduction <add>, %26, %cst_11 [0] : vector<8x128xf32> to vector<128xf32>
    %28 = vector.shape_cast %27 : vector<128xf32> to vector<1x128xf32>
    %cst_12 = arith.constant 1.250000e-01 : f32
    %29 = vector.broadcast %cst_12 : f32 to vector<1x128xf32>
    %30 = arith.mulf %28, %29 : vector<1x128xf32>
    %31 = arith.mulf %25, %25 : vector<1x128xf32>
    %32 = arith.subf %30, %31 : vector<1x128xf32>
    %cst_13 = arith.constant 0.000000e+00 : f32
    %33 = vector.broadcast %cst_13 : f32 to vector<1x128xf32>
    %34 = arith.maximumf %32, %33 : vector<1x128xf32>
    %cst_14 = arith.constant 9.99999974E-6 : f32
    %35 = vector.broadcast %cst_14 : f32 to vector<1x128xf32>
    %36 = arith.addf %34, %35 : vector<1x128xf32>
    %37 = math.rsqrt %36 : vector<1x128xf32>
    %38 = vector.broadcast %25 : vector<1x128xf32> to vector<8x128xf32>
    %39 = arith.subf %14, %38 : vector<8x128xf32>
    %40 = vector.broadcast %37 : vector<1x128xf32> to vector<8x128xf32>
    %41 = arith.mulf %39, %40 : vector<8x128xf32>
    %42 = vector.extract_strided_slice %4 {offsets = [1, 0], sizes = [1, 128], strides = [1, 1]} : vector<8x128xf32> to vector<1x128xf32>
    %43 = vector.broadcast %42 : vector<1x128xf32> to vector<8x128xf32>
    %44 = arith.mulf %41, %43 : vector<8x128xf32>
    %45 = vector.extract_strided_slice %4 {offsets = [2, 0], sizes = [1, 128], strides = [1, 1]} : vector<8x128xf32> to vector<1x128xf32>
    %46 = vector.broadcast %45 : vector<1x128xf32> to vector<8x128xf32>
    %47 = arith.addf %44, %46 : vector<8x128xf32>
    %c0_15 = arith.constant 0 : index
    %c0_16 = arith.constant 0 : index
    %48 = vector.load %arg9[%c0_15, %c0_16] : memref<8x128xf32, #tpu.memory_space<vmem>>, vector<8x128xf32>
    tpu.vector_store %arg9[%c0_15, %c0_16], %47 {strides = array<i32>} : memref<8x128xf32, #tpu.memory_space<vmem>>, vector<8x128xf32>,
    %c1_i32 = arith.constant 1 : i32
    %49 = arith.cmpi eq, %arg0, %c1_i32 : i32
    %50 = arith.extui %49 : i1 to i32
    %c0_i32_17 = arith.constant 0 : i32
    %51 = arith.cmpi ne, %50, %c0_i32_17 : i32
    scf.if %51 {
      %52 = arith.truncf %47 : vector<8x128xf32> to vector<8x128xbf16>
      %c0_18 = arith.constant 0 : index
      %c0_19 = arith.constant 0 : index
      %53 = vector.load %arg6[%c0_18, %c0_19] : memref<128x128xbf16, #tpu.memory_space<vmem>>, vector<128x128xbf16>
      %cst_20 = arith.constant dense<0.000000e+00> : vector<8x128xf32>
      %54 = tpu.matmul %52, %53, %cst_20 {dimension_numbers = #tpu.dot_dimension_numbers<[1], [0], [0], [1], [0, 0, 1, 1], [], []>} : vector<8x128xbf16>, vector<128x128xbf16>, vector<8x128xf32> -> vector<8x128xf32>
      %c0_21 = arith.constant 0 : index
      %c0_22 = arith.constant 0 : index
      %55 = vector.load %arg7[%c0_21, %c0_22] : memref<1x128xf32, #tpu.memory_space<vmem>>, vector<1x128xf32>
      %56 = vector.broadcast %55 : vector<1x128xf32> to vector<8x128xf32>
      %57 = arith.addf %54, %56 : vector<8x128xf32>
      %c0_23 = arith.constant 0 : index
      %c0_24 = arith.constant 0 : index
      %58 = vector.load %arg8[%c0_23, %c0_24] : memref<8x128xf32, #tpu.memory_space<vmem>>, vector<8x128xf32>
      tpu.vector_store %arg8[%c0_23, %c0_24], %57 {strides = array<i32>} : memref<8x128xf32, #tpu.memory_space<vmem>>, vector<8x128xf32>,
    } else {
    }
    return
  }
  func.func @transform_0(%arg0: i32) -> (i32, i32) {
    %c0_i32 = arith.constant 0 : i32
    %c0_i32_0 = arith.constant 0 : i32
    %c0_i32_1 = arith.constant 0 : i32
    return %c0_i32, %c0_i32_0 : i32, i32
  }
  func.func @transform_1(%arg0: i32) -> (i32, i32) {
    %c0_i32 = arith.constant 0 : i32
    %c0_i32_0 = arith.constant 0 : i32
    %c0_i32_1 = arith.constant 0 : i32
    return %c0_i32, %c0_i32_0 : i32, i32
  }
  func.func @transform_2(%arg0: i32) -> (i32, i32) {
    %c0_i32 = arith.constant 0 : i32
    %c0_i32_0 = arith.constant 0 : i32
    %c0_i32_1 = arith.constant 0 : i32
    return %c0_i32, %c0_i32_0 : i32, i32
  }
  func.func @transform_3(%arg0: i32) -> (i32, i32, i32) {
    %c0_i32 = arith.constant 0 : i32
    %c0_i32_0 = arith.constant 0 : i32
    %c0_i32_1 = arith.constant 0 : i32
    return %arg0, %c0_i32, %c0_i32_0 : i32, i32, i32
  }
  func.func @transform_4(%arg0: i32) -> (i32, i32, i32) {
    %c0_i32 = arith.constant 0 : i32
    %c0_i32_0 = arith.constant 0 : i32
    %c0_i32_1 = arith.constant 0 : i32
    return %arg0, %c0_i32, %c0_i32_0 : i32, i32, i32
  }
  func.func @transform_5(%arg0: i32) -> (i32, i32) {
    %c0_i32 = arith.constant 0 : i32
    %c0_i32_0 = arith.constant 0 : i32
    %c0_i32_1 = arith.constant 0 : i32
    return %c0_i32, %c0_i32_0 : i32, i32
  }
  func.func @transform_6(%arg0: i32) -> (i32, i32) {
    %c0_i32 = arith.constant 0 : i32
    %c0_i32_0 = arith.constant 0 : i32
    %c0_i32_1 = arith.constant 0 : i32
    return %c0_i32, %c0_i32_0 : i32, i32
  }
  func.func @transform_7(%arg0: i32) -> (i32, i32) {
    %c0_i32 = arith.constant 0 : i32
    %c0_i32_0 = arith.constant 0 : i32
    %c0_i32_1 = arith.constant 0 : i32
    return %c0_i32, %c0_i32_0 : i32, i32
  }
}

</mosaic_0001>

<bundles_post_ra>
// kernel: fused_mlp.1
= control target key start
LH: loop header
LB: loop body
LE: loop exit
PB: predicated region body
PF: predicated region fallthrough
CT: control target
= control target key end

     0   :  { %12 = vsyncpa [#allocation4], 0  ;;  %s1242_s0 = inlined_call_operand.vmem [shape: f32[8,128], index: 0, kind: input, shape index: {}]   ;;  %s1243_s1 = inlined_call_operand.hbm [shape: bf16[128,128], index: 1, kind: input, shape index: {}]   ;;  %s1244_s2 = inlined_call_operand.vmem [shape: f32[1,128], index: 2, kind: input, shape index: {}]   ;;  %s1245_s3 = inlined_call_operand.hbm [shape: bf16[2,128,128], index: 3, kind: input, shape index: {}]   ;;  %s1246_s4 = inlined_call_operand.vmem [shape: f32[2,8,128], index: 4, kind: input, shape index: {}]   ;;  %s1247_s5 = inlined_call_operand.hbm [shape: bf16[128,128], index: 5, kind: input, shape index: {}]   ;;  %s1248_s6 = inlined_call_operand.vmem [shape: f32[1,128], index: 6, kind: input, shape index: {}]   ;;  %s1249_s7 = inlined_call_operand.vmem [shape: f32[8,128], index: 7, kind: output, shape index: {}]  }
   0x1   :  { %13 = vsyncpa [#allocation6], 0 }
   0x2   :  { %15 = vsyncpa [#allocation6 + $0x1], 0  ;;  %s1090_s24 = smov 0   ;;  %s1092_s25 = smov 0  }
   0x3   :  { %s1094_s26 = smov 0   ;;  %s1096_s27 = smov 0  }
   0x4 LB: > { %s1109_s28 = sadd.s32 4294967295, %s1044_s27   ;;  %p104_p0 = scmp.ne.s32.totalorder %s1036_s25, %s1032_s24  ;;  %s1044_s27 = sphi %s1096_s27, %s1259_s27   ;;  %s1040_s26 = sphi %s1094_s26, %s1258_s26   ;;  %s1036_s25 = sphi %s1092_s25, %s1257_s25   ;;  %s1032_s24 = sphi %s1090_s24, %s1256_s24  }
   0x5   : > { %p105_p1 = scmp.eq.s32.totalorder %s1109_s28, 0  ;;  %p709_p2 = scmp.ge.s32.totalorder %s1044_s27, 1 }
   0x6   : > { %p204_p3 = scmp.lt.s32.totalorder %s1044_s27, 3  ;;  %p710_p4 = scmp.ne.s32.totalorder %s1109_s28, 0 }
   0x7   : > { %p1118_p5 = por %p105_p1, %p104_p0  ;;  %s235_s10 = sshll.u32 %s1247_s5, 4  ;;  %s236_s10 = int_to_ptr.hbm [resolvable:$true] %s235_s10 }
   0x8   : > { %p1122_p6 = pnand %p709_p2, %p204_p3  ;;  %s1046_s11 = smov [#allocation7]  }
   0x9   : > { %s237_s12 = sshll.u32 %s1046_s11, 4  ;;  %s218_s15 = sshll.u32 %s1243_s1, 4  ;;  %s238_s12 = int_to_ptr.vmem [resolvable:$true] %s237_s12  ;;  %s219_s15 = int_to_ptr.hbm [resolvable:$true] %s218_s15 }
   0xa   : > { %p856_p7 = pneg %p1122_p6  ;;  %s1250_s16 = smov 64  }
   0xb   : > { %s1048_s17 = smov 4   ;;  %s1049_s18 = smov [#allocation3]  }
   0xc   : > { %p857_p8 = pnand %p856_p7, %p105_p1  ;;  %s220_s19 = sshll.u32 %s1049_s18, 4  ;;  %s221_s19 = int_to_ptr.vmem [resolvable:$true] %s220_s19 }
   0xd   : > { %s1143_s20 = sadd.s32 1, %s1044_s27   ;;  %s91_s21 = sadd.s32 1, %s1040_s26 }
   0xe   : > { %862 = dma.hbm_to_vmem [thread:$0]  (!%p857_p8), %s236_s10, 1024, %s238_s12, [#allocation6], %s1250_s16, %s1250_s16, %s1048_s17  }
   0xf   : > { %859 = dma.hbm_to_vmem [thread:$0]  (!%p857_p8), %s219_s15, 1024, %s221_s19, [#allocation4], %s1250_s16, %s1250_s16, %s1048_s17  }
  0x10   : > { %s88_s22 = ssub.s32 %s1044_s27, %s1143_s20  ;;  %p98_p9 = scmp.ne.s32.totalorder %s1040_s26, %s1036_s25 }
  0x11   : > { %p89_p10 = scmp.eq.s32.totalorder %s88_s22, 0  ;;  %p99_p11 = scmp.eq.s32.totalorder %s1044_s27, 0 }
  0x12   : > { %p869_p12 = scmp.lt.s32.totalorder %s1044_s27, 2  ;;  %s254_s23 = sand.u32 1, %s1044_s27  }
  0x13   : > { %s1154_s24 = scalar_select %p89_p10, %s1040_s26, %s91_s21  }
  0x14   : > { %p100_p13 = por %p99_p11, %p98_p9  ;;  %s256_s8 = sand.u32 1, %s1040_s26  }
  0x15   : > { %s821_s9 = sshll.u32 %s1044_s27, 6  ;;  %s713_s10 = sshll.u32 %s256_s8, 6 }
  0x16   : > { %s263_s13 = scalar_lea.hbm %s1245_s3, %s821_s9  ;;  %s258_s15 = scalar_lea.vmem [#allocation5], %s713_s10 }
  0x17   : > { %s264_s14 = sshll.u32 %s263_s13, 4  ;;  %s266_s18 = sshll.u32 %s258_s15, 4  ;;  %s265_s14 = int_to_ptr.hbm [resolvable:$true] %s264_s14  ;;  %s267_s18 = int_to_ptr.vmem [resolvable:$true] %s266_s18 }
  0x18   : > { %p1163_p0 = pnand %p869_p12, %p100_p13  ;;  %s255_s21 = scalar_lea.sflag [#allocation6], %s254_s23 }
  0x19   : > { %s972_s22 = sshra.s32 %s265_s14, 4  ;;  %s979_s10 = scalar_lea.hbm %s1245_s3, 128  ;;  %s973_s22 = int_to_ptr.hbm [resolvable:$true] %s972_s22 }
  0x1a   : > { %s974_s16 = scalar_lea.hbm %s973_s22, 64  ;;  %p976_p3 = pneg %p1163_p0 }
  0x1b   : > { %p975_p2 = scmp.ne.s32.totalorder %s973_s22, %s974_s16  ;;  %p980_p9 = scmp.lt.s32.totalorder %s973_s22, %s1245_s3 }
  0x1c   : > { %p981_p10 = scmp.lt.s32.totalorder %s979_s10, %s974_s16 }
  0x1d   : > { %p977_p7 = pnand %p976_p3, %p975_p2 }
  0x1e   : > { %p982_p11 = por %p981_p10, %p980_p9 }
  0x1f   : > { %p978_p8 = pneg %p977_p7 }
  0x21   : > { %p983_p12 = pnand %p982_p11, %p978_p8 }
  0x23   : > { %986 = shalt.err (!%p983_p12)
}
  0x24   : > { %s1254_s23 = smov 64   ;;  %285 = sbr.rel (%p1122_p6) target bundleno = 595 (0x253), region = 48 }
  0x25   : > { %866 = dma.hbm_to_vmem [thread:$0]  (!%p1163_p0), %s265_s14, 1024, %s267_s18, %s255_s21, %s1254_s23, %s1254_s23, %s1048_s17  }
  0x29   : > { %1019 = dma.done.wait (%p105_p1), [#allocation4], 1024  }
  0x2a   : > { %1021 = vsyncadd (%p105_p1), [#allocation4], 4294966272  ;;  %s292_s16 = sand.u32 1, %s1109_s28   ;;  %s294_s12 = sand.u32 1, %s1036_s25  }
  0x2b   : > { %s718_s13 = sshll.u32 %s294_s12, 6  ;;  %s293_s15 = scalar_lea.sflag [#allocation6], %s292_s16 }
  0x2c   : > { %s1188_s19 = scalar_lea.vmem [#allocation5], %s718_s13 }
  0x2d   : > { %1023 = dma.done.wait (%p1118_p5), %s293_s15, 1024  }
  0x2e   : > { %1025 = vsyncadd (%p1118_p5), %s293_s15, 4294966272 }
  0x2f   : > { %1027 = dma.done.wait (%p105_p1), [#allocation6], 1024  }
  0x30   : > { %1029 = vsyncadd (%p105_p1), [#allocation6], 4294966272  ;;  %p332_p6 = scmp.lt.s32.totalorder %s1109_s28, 1 }
  0x31   : > { %339 = sbr.rel (%p710_p4) target bundleno = 220 (0xdc), region = 64 }
  0x32   : > { %s333_s30 = scalar_select %p332_p6, %s1109_s28, 1 }
  0x34   : > { %s720_s17 = sshll.u32 %s333_s30, 3 }
  0x35   : > { %s1203_s21 = scalar_lea.vmem %s1246_s4, %s720_s17 }
  0x36   : > { %v829_v0 = vld [vmem:[#allocation3 + $0x38] sm:$0xff]  ;;  %v828_v1 = vld [vmem:[#allocation3 + $0x30] sm:$0xff]  ;;  %v827_v2 = vld [vmem:[#allocation3 + $0x28] sm:$0xff] }
  0x37   : > { %410 = vmatpush.bf16.msra.mxu0 %v829_v0  ;;  %v826_v3 = vld [vmem:[#allocation3 + $0x20] sm:$0xff]  ;;  %v825_v4 = vld [vmem:[#allocation3 + $0x18] sm:$0xff]  ;;  %v824_v5 = vld [vmem:[#allocation3 + $0x10] sm:$0xff] }
  0x38   : > { %v823_v6 = vld [vmem:[#allocation3 + $0x8] sm:$0xff]  ;;  %v822_v7 = vld [vmem:[#allocation3] sm:$0xff]  ;;  %v340_v8 = vld [vmem:[%s1242_s0] sm:$0xff] }
  0x39   : > { %v341_v9 = vpack.c.bf16 %v340_v8, %v340_v8  ;;  %v908_v10 = vld [vmem:[%s1244_s2] ss:$0 sm:$0xff] }
  0x3b   : > { %411 = vmatpush.bf16.msra.mxu0 %v828_v1 }
  0x3f   : > { %412 = vmatpush.bf16.msra.mxu0 %v827_v2 }
  0x43   : > { %413 = vmatpush.bf16.msra.mxu0 %v826_v3 }
  0x47   : > { %414 = vmatpush.bf16.msra.mxu0 %v825_v4 }
  0x4b   : > { %415 = vmatpush.bf16.msra.mxu0 %v824_v5 }
  0x4f   : > { %416 = vmatpush.bf16.msra.mxu0 %v823_v6 }
  0x53   : > { %417 = vmatpush.bf16.msra.mxu0 %v822_v7 }
  0x56   : > { %418 = vmatmul.bf16.vlgmr.msra.gmra.mxu0 %v341_v9 }
  0xd3   : > { %v419_v11 = vpop.f32.mrf.mxu0 }
  0xd4   : > { %v420_v12 = vadd.f32 %v908_v10, %v419_v11 }
  0xd6   : > { %v423_v13 = vmax.f32 %v420_v12, 0.0 }
  0xd8   : > { %424 = vst [vmem:[#allocation2] sm:$0xff] %v423_v13 }
  0xdb   : > { %v421_v14 = vpop.f32.mrf.mxu0 }
  0xdc PF: > { %v837_v15 = vld [vmem:[%s1188_s19 + $0x38] sm:$0xff]  ;;  %v836_v16 = vld [vmem:[%s1188_s19 + $0x30] sm:$0xff]  ;;  %v835_v17 = vld [vmem:[%s1188_s19 + $0x28] sm:$0xff]  ;;  %p786_p1 = scmp.ne.s32.totalorder %s1109_s28, 1 }
  0xdd   : > { %493 = vmatpush.bf16.msra.mxu0 %v837_v15  ;;  %v834_v18 = vld [vmem:[%s1188_s19 + $0x20] sm:$0xff]  ;;  %v833_v19 = vld [vmem:[%s1188_s19 + $0x18] sm:$0xff]  ;;  %v832_v20 = vld [vmem:[%s1188_s19 + $0x10] sm:$0xff] }
  0xde   : > { %v831_v21 = vld [vmem:[%s1188_s19 + $0x8] sm:$0xff]  ;;  %v830_v22 = vld [vmem:[%s1188_s19] sm:$0xff]  ;;  %v425_v25 = vld [vmem:[%s1203_s21] sm:$0xff] }
  0xdf   : > { %v426_v23 = vld [vmem:[#allocation2] sm:$0xff]  ;;  %v444_v26 = vperm.slane %v425_v25, 0  ;;  %v544_v57 = vperm.slane %v425_v25, 1  ;;  %v546_v60 = vperm.slane %v425_v25, 2 }
  0xe0   : > { %v427_v24 = vpack.c.bf16 %v426_v23, %v426_v23 }
  0xe1   : > { %494 = vmatpush.bf16.msra.mxu0 %v836_v16 }
  0xe5   : > { %495 = vmatpush.bf16.msra.mxu0 %v835_v17 }
  0xe9   : > { %496 = vmatpush.bf16.msra.mxu0 %v834_v18 }
  0xed   : > { %497 = vmatpush.bf16.msra.mxu0 %v833_v19 }
  0xf1   : > { %498 = vmatpush.bf16.msra.mxu0 %v832_v20 }
  0xf5   : > { %499 = vmatpush.bf16.msra.mxu0 %v831_v21 }
  0xf9   : > { %500 = vmatpush.bf16.msra.mxu0 %v830_v22 }
  0xfc   : > { %501 = vmatmul.bf16.vlgmr.msra.gmra.mxu0 %v427_v24 }
 0x179   : > { %v502_v27 = vpop.f32.mrf.mxu0 }
 0x17a   : > { %v503_v28 = vadd.f32 %v502_v27, %v444_v26 }
 0x17c   : > { %v506_v29 = vmax.f32 %v503_v28, 0.0 }
 0x17e   : > { %v513_v30 = vrot.slane %v506_v29, 4  ;;  %v520_v31 = vmul.f32 %v506_v29, %v506_v29 }
 0x180   : > { %v514_v32 = vadd.f32 %v513_v30, %v506_v29  ;;  %v521_v33 = vrot.slane %v520_v31, 4 }
 0x181   : > { %v504_v34 = vpop.f32.mrf.mxu0 }
 0x182   : > { %v515_v35 = vrot.slane %v514_v32, 2  ;;  %v522_v36 = vadd.f32 %v521_v33, %v520_v31 }
 0x184   : > { %v516_v37 = vadd.f32 %v515_v35, %v514_v32  ;;  %v523_v38 = vrot.slane %v522_v36, 2 }
 0x186   : > { %v517_v39 = vrot.slane %v516_v37, 1  ;;  %v524_v40 = vadd.f32 %v523_v38, %v522_v36 }
 0x188   : > { %v518_v41 = vadd.f32 %v517_v39, %v516_v37  ;;  %v525_v42 = vrot.slane %v524_v40, 1 }
 0x18a   : > { %v519_v43 = vmul.f32 0.125, %v518_v41  ;;  %v526_v44 = vadd.f32 %v525_v42, %v524_v40 }
 0x18c   : > { %v527_v45 = vmul.f32 0.125, %v526_v44  ;;  %v528_v46 = vmul.f32 %v519_v43, %v519_v43  ;;  %v542_v56 = vsub.f32 %v506_v29, %v519_v43 }
 0x18e   : > { %v529_v47 = vsub.f32 %v527_v45, %v528_v46 }
 0x190   : > { %v530_v48 = vmax.f32 %v529_v47, 0.0 }
 0x192   : > { %v531_v49 = vadd.f32 1e-05, %v530_v48 }
 0x194   : > { %909 = vrsqrt.f32 %v531_v49  ;;  %vm538_vm1 = vweird.f32 %v531_v49 }
 0x19a   : > { %v910_v50 = vpop.eup %909 }
 0x19b   : > { %v533_v51 = vmul.f32 %v910_v50, %v531_v49  ;;  %vm539_vm0 = vweird.f32 %v910_v50 }
 0x19c   : > { %vm540_vm2 = vmor %vm538_vm1, %vm539_vm0 }
 0x19d   : > { %v534_v52 = vmul.f32 %v910_v50, %v533_v51 }
 0x19f   : > { %v535_v53 = vmul.f32 0.5, %v534_v52 }
 0x1a1   : > { %v536_v54 = vsub.f32 1.5, %v535_v53 }
 0x1a3   : > { %v537_v55 = vmul.f32 %v910_v50, %v536_v54 }
 0x1a5   : > { %v541_v58 = vsel %vm540_vm2, %v910_v50, %v537_v55 }
 0x1a6   : > { %v543_v59 = vmul.f32 %v542_v56, %v541_v58 }
 0x1a8   : > { %v545_v61 = vmul.f32 %v544_v57, %v543_v59  ;;  %552 = sbr.rel (%p786_p1) target bundleno = 595 (0x253), region = 68 }
 0x1aa   : > { %v547_v62 = vadd.f32 %v546_v60, %v545_v61 }
 0x1ac   : > { %548 = vst [vmem:[#allocation2] sm:$0xff] %v547_v62 }
 0x1ad   : > { %v845_v63 = vld [vmem:[#allocation7 + $0x38] sm:$0xff]  ;;  %v844_v0 = vld [vmem:[#allocation7 + $0x30] sm:$0xff]  ;;  %v843_v1 = vld [vmem:[#allocation7 + $0x28] sm:$0xff]  ;;  %v553_v7 = vpack.c.bf16 %v547_v62, %v547_v62 }
 0x1ae   : > { %622 = vmatpush.bf16.msra.mxu0 %v845_v63  ;;  %v842_v2 = vld [vmem:[#allocation7 + $0x20] sm:$0xff]  ;;  %v841_v3 = vld [vmem:[#allocation7 + $0x18] sm:$0xff]  ;;  %v840_v4 = vld [vmem:[#allocation7 + $0x10] sm:$0xff] }
 0x1af   : > { %v839_v5 = vld [vmem:[#allocation7 + $0x8] sm:$0xff]  ;;  %v838_v6 = vld [vmem:[#allocation7] sm:$0xff]  ;;  %v911_v8 = vld [vmem:[%s1248_s6] ss:$0 sm:$0xff] }
 0x1b2   : > { %623 = vmatpush.bf16.msra.mxu0 %v844_v0 }
 0x1b6   : > { %624 = vmatpush.bf16.msra.mxu0 %v843_v1 }
 0x1ba   : > { %625 = vmatpush.bf16.msra.mxu0 %v842_v2 }
 0x1be   : > { %626 = vmatpush.bf16.msra.mxu0 %v841_v3 }
 0x1c2   : > { %627 = vmatpush.bf16.msra.mxu0 %v840_v4 }
 0x1c6   : > { %628 = vmatpush.bf16.msra.mxu0 %v839_v5 }
 0x1ca   : > { %629 = vmatpush.bf16.msra.mxu0 %v838_v6 }
 0x1cd   : > { %630 = vmatmul.bf16.vlgmr.msra.gmra.mxu0 %v553_v7 }
 0x24a   : > { %v631_v9 = vpop.f32.mrf.mxu0 }
 0x24b   : > { %v632_v10 = vadd.f32 %v911_v8, %v631_v9 }
 0x24d   : > { %635 = vst [vmem:[%s1249_s7] sm:$0xff] %v632_v10 }
 0x252   : > { %v633_v11 = vpop.f32.mrf.mxu0 }
 0x253 PF: > { %s1255_s23 = smov %s1154_s24  ;;  %p18_p4 = scmp.ge.s32.totalorder %s1143_s20, 4  }
 0x254   : > { %s1256_s24 = smov %s1036_s25  ;;  %s1257_s25 = smov %s1040_s26 }
 0x255   : > { %s1258_s26 = smov %s1255_s23  ;;  %s1259_s27 = smov %s1143_s20 }
 0x256   :  { %20 = sbr.rel (!%p18_p4) target bundleno = 4 (0x4), region = 104 }
 0x25b   :  { %647 = vsyncpa [#allocation4], 1 }
 0x25c   :  { %649 = vsyncpa [#allocation4 + $0x1], 1 }
 0x25d   :  { %650 = vsyncpa [#allocation6], 1 }
 0x25e   :  { %652 = vsyncpa [#allocation6 + $0x1], 1 }

</bundles_post_ra>
